<compile_context>
chip_gen: v7x
topology: tpu7x:2x2x1
jax: 0.10.0
libtpu: 0.0.40
codegen_flags: <defaults>
</compile_context>

<pallas_src>
import jax
import jax.numpy as jnp
from jax import lax
from jax.experimental import pallas as pl
from jax.experimental.pallas import tpu as pltpu


def _round_up(x, m):
    return ((x + m - 1) // m) * m


# ----------------------------------------------------------------------------
# Kernel 1: multi-layer tanh RNN recurrence (time-major, flattened (T*B, *)).
# ----------------------------------------------------------------------------
def make_rnn_kernel(num_layers, T, B, H, compute_dtype):
    """Ref order:
      x_ref (T*B, E),
      per layer l: wih_t (in_dim, H), whh_t (H, H), bias (1, H)   [bias = b_ih+b_hh]
      out_ref (T*B, H)                                            [last layer's h_t]
      cur_ref scratch (T*B, H) compute_dtype                      [inter-layer acts]
      pre_ref scratch (T*B, H) f32                                [x @ W_ih + bias]
    """
    unroll = True if T <= 32 else 8   # LLO visibility across timesteps

    def kernel(x_ref, *args):
        layer_refs = [args[3 * l:3 * l + 3] for l in range(num_layers)]
        out_ref = args[3 * num_layers]
        cur_ref = args[3 * num_layers + 1]
        pre_ref = args[3 * num_layers + 2]

        for l in range(num_layers):
            wih_t_ref, whh_t_ref, bias_ref = layer_refs[l]
            wih_t = wih_t_ref[...]            # (in_dim, H)
            whh_t = whh_t_ref[...]            # (H, H)
            bias = bias_ref[...]              # (1, H) f32, b_ih + b_hh folded

            x_l = x_ref[...] if l == 0 else cur_ref[...]

            # Hoisted input projection: one big batched MXU matmul per layer,
            # bias folded in, result kept in f32 scratch.
            pre_ref[...] = (
                jnp.dot(x_l, wih_t, preferred_element_type=jnp.float32) + bias
            )

            # Last layer writes straight to the kernel output.
            dst_ref = out_ref if l == num_layers - 1 else cur_ref

            def step(t, h, whh_t=whh_t, dst_ref=dst_ref):
                r = pl.multiple_of(t * B, B)
                pre_t = pre_ref[pl.ds(r, B), :]                       # (B, H) f32
                h_new = jnp.tanh(
                    pre_t
                    + jnp.dot(h, whh_t, preferred_element_type=jnp.float32)
                )                                                     # f32
                dst_ref[pl.ds(r, B), :] = h_new.astype(dst_ref.dtype)
                return h_new.astype(compute_dtype)

            lax.fori_loop(0, T, step, jnp.zeros((B, H), compute_dtype),
                          unroll=unroll)

    return kernel


# ----------------------------------------------------------------------------
# Kernel 2: tiled vocab projection head (lane-dense, pipelined grid).
# ----------------------------------------------------------------------------
def fc_head_kernel(hid_ref, w_ref, b_ref, out_ref):
    out_ref[...] = (
        jnp.dot(hid_ref[...], w_ref[...], preferred_element_type=jnp.float32)
        + b_ref[...]
    )


def rnn_model_forward(src, params, *, num_layers, compute_dtype=jnp.float32):
    """src: (B, T) int32 token ids. Returns logits (B, T, vocab) float32.

    compute_dtype: matmul-operand dtype (f32 or bf16).  Accumulation and tanh
    stay f32 regardless.  (On v5e prefer f32; on v6e/v7x bf16 is MXU-native.)
    """
    emb = params["embedding"]               # (V, E)
    V, E = emb.shape
    H = params["w_hh_0"].shape[0]
    B, T = src.shape
    N = T * B

    # Glue: embedding gather + transpose to time-major, flattened to 2D.
    x = jnp.take(emb, src, axis=0)                                   # (B, T, E)
    x_flat = jnp.transpose(x, (1, 0, 2)).reshape(N, E).astype(compute_dtype)

    # Glue: pre-transpose weights (plain x @ W in-kernel, no XLU) and fold
    # the two RNN biases into one at trace time.
    kernel_inputs = [x_flat]
    for l in range(num_layers):
        kernel_inputs.append(
            jnp.transpose(params[f"w_ih_{l}"]).astype(compute_dtype))   # (in, H)
        kernel_inputs.append(
            jnp.transpose(params[f"w_hh_{l}"]).astype(compute_dtype))   # (H, H)
        kernel_inputs.append(
            (params[f"b_ih_{l}"] + params[f"b_hh_{l}"])
            .reshape(1, H).astype(jnp.float32))                         # (1, H)

    vmem = pl.BlockSpec(memory_space=pltpu.MemorySpace.VMEM)
    rnn_kernel = make_rnn_kernel(num_layers, T, B, H, compute_dtype)
    hid = pl.pallas_call(
        rnn_kernel,
        out_shape=jax.ShapeDtypeStruct((N, H), compute_dtype),
        in_specs=[vmem] * len(kernel_inputs),
        out_specs=vmem,
        scratch_shapes=[
            pltpu.VMEM((N, H), compute_dtype),   # cur: previous layer's outputs
            pltpu.VMEM((N, H), jnp.float32),     # pre: x @ W_ih + bias
        ],
    )(*kernel_inputs)                            # (N, H)

    # ---- FC head: tiled matmul over a real grid, vocab padded lane-dense ----
    fcw_t = jnp.transpose(params["fc_w"]).astype(compute_dtype)     # (H, V)
    fcb = params["fc_b"].astype(jnp.float32)                        # (V,)

    tn = 256 if V >= 256 else 128                # 256-wide tiles for v6e/v7x MXU
    V_pad = _round_up(V, tn)
    fcw_t = jnp.pad(fcw_t, ((0, 0), (0, V_pad - V)))
    fcb = jnp.pad(fcb, (0, V_pad - V)).reshape(1, V_pad)

    if N >= 256:
        tm = 256
    else:
        tm = _round_up(N, 8)
    N_pad = _round_up(N, tm)
    hid_p = jnp.pad(hid, ((0, N_pad - N), (0, 0)))

    logits_pad = pl.pallas_call(
        fc_head_kernel,
        out_shape=jax.ShapeDtypeStruct((N_pad, V_pad), jnp.float32),
        grid=(N_pad // tm, V_pad // tn),
        in_specs=[
            pl.BlockSpec((tm, H), lambda i, j: (i, 0)),   # hidden rows
            pl.BlockSpec((H, tn), lambda i, j: (0, j)),   # fc weight cols
            pl.BlockSpec((1, tn), lambda i, j: (0, j)),   # fc bias cols
        ],
        out_specs=pl.BlockSpec((tm, tn), lambda i, j: (i, j)),
        compiler_params=pltpu.CompilerParams(
            dimension_semantics=("parallel", "parallel")),
    )(hid_p, fcw_t, fcb)

    logits = logits_pad[:N, :V].astype(jnp.float32).reshape(T, B, V)
    return jnp.transpose(logits, (1, 0, 2))      # back to batch_first (B, T, V)


# ----------------------------------------------------------------------------
# Params / reference
# ----------------------------------------------------------------------------
def init_params(key, vocab_size, embed_size, hidden_size, num_layers):
    """Deterministic synthetic init (PyTorch-style uniform ranges)."""
    params = {}
    keys = jax.random.split(key, 3 + 4 * num_layers)
    ki = iter(keys)

    params["embedding"] = jax.random.normal(
        next(ki), (vocab_size, embed_size), jnp.float32)

    k = 1.0 / jnp.sqrt(hidden_size)
    for l in range(num_layers):
        in_dim = embed_size if l == 0 else hidden_size
        params[f"w_ih_{l}"] = jax.random.uniform(
            next(ki), (hidden_size, in_dim), jnp.float32, -k, k)
        params[f"w_hh_{l}"] = jax.random.uniform(
            next(ki), (hidden_size, hidden_size), jnp.float32, -k, k)
        params[f"b_ih_{l}"] = jax.random.uniform(
            next(ki), (hidden_size,), jnp.float32, -k, k)
        params[f"b_hh_{l}"] = jax.random.uniform(
            next(ki), (hidden_size,), jnp.float32, -k, k)

    params["fc_w"] = jax.random.uniform(
        next(ki), (vocab_size, hidden_size), jnp.float32, -k, k)
    params["fc_b"] = jax.random.uniform(
        next(ki), (vocab_size,), jnp.float32, -k, k)
    return params


def reference_forward(src, params, *, num_layers):
    """Pure-JAX reference mirroring torch nn.Embedding -> nn.RNN(tanh) -> nn.Linear."""
    x = jnp.take(params["embedding"], src, axis=0)   # (B, T, E)
    B, T, _ = x.shape
    H = params["fc_w"].shape[1]
    layer_in = x
    for l in range(num_layers):
        w_ih = params[f"w_ih_{l}"]
        w_hh = params[f"w_hh_{l}"]
        b_ih = params[f"b_ih_{l}"]
        b_hh = params[f"b_hh_{l}"]

        def step(h, x_t):
            h_new = jnp.tanh(x_t @ w_ih.T + b_ih + h @ w_hh.T + b_hh)
            return h_new, h_new

        _, outs = lax.scan(step, jnp.zeros((B, H), jnp.float32),
                           jnp.transpose(layer_in, (1, 0, 2)))
        layer_in = jnp.transpose(outs, (1, 0, 2))     # (B, T, H)
    return layer_in @ params["fc_w"].T + params["fc_b"]


if __name__ == "__main__":
    # Small config implied by the module: vocab from tokenizer, embed/hidden dims.
    VOCAB_SIZE = 16
    EMBED_SIZE = 32
    HIDDEN_SIZE = 32
    NUM_LAYERS = 2
    B, T = 2, 8

    root = jax.random.PRNGKey(0)
    k_params, k_tokens = jax.random.split(root)
    params = init_params(k_params, VOCAB_SIZE, EMBED_SIZE, HIDDEN_SIZE, NUM_LAYERS)
    src = jax.random.randint(k_tokens, (B, T), 0, VOCAB_SIZE, dtype=jnp.int32)

    # f32 path: exact check against the pure-JAX reference.
    logits = jax.block_until_ready(
        rnn_model_forward(src, params, num_layers=NUM_LAYERS))
    ref = reference_forward(src, params, num_layers=NUM_LAYERS)
    assert logits.shape == (B, T, VOCAB_SIZE)
    assert jnp.allclose(logits, ref, atol=1e-5, rtol=1e-5)

    # bf16-operand path (f32 accumulation + f32 tanh): loose check vs f32 ref.
    logits_bf16 = jax.block_until_ready(
        rnn_model_forward(src, params, num_layers=NUM_LAYERS,
                          compute_dtype=jnp.bfloat16))
    assert logits_bf16.shape == (B, T, VOCAB_SIZE)
    assert bool(jnp.all(jnp.isfinite(logits_bf16)))
    assert float(jnp.max(jnp.abs(logits_bf16 - ref))) < 0.1

    print("KERNEL_OK")
</pallas_src>

<mosaic_0001>
module attributes {stable_mosaic.version = 11 : i64} {
  func.func @kernel(%arg0: memref<16x32xf32, #tpu.memory_space<vmem>>, %arg1: memref<32x32xf32, #tpu.memory_space<vmem>>, %arg2: memref<32x32xf32, #tpu.memory_space<vmem>>, %arg3: memref<1x32xf32, #tpu.memory_space<vmem>>, %arg4: memref<32x32xf32, #tpu.memory_space<vmem>>, %arg5: memref<32x32xf32, #tpu.memory_space<vmem>>, %arg6: memref<1x32xf32, #tpu.memory_space<vmem>>, %arg7: memref<16x32xf32, #tpu.memory_space<vmem>>, %arg8: memref<16x32xf32, #tpu.memory_space<vmem>>, %arg9: memref<16x32xf32, #tpu.memory_space<vmem>>) attributes {dimension_semantics = [], scalar_prefetch = 0 : i64, scratch_operands = 2 : i64, tpu.core_type = #tpu.core_type<tc>} {
    %c0 = arith.constant 0 : index
    %c0_0 = arith.constant 0 : index
    %0 = vector.load %arg1[%c0, %c0_0] : memref<32x32xf32, #tpu.memory_space<vmem>>, vector<32x32xf32>
    %c0_1 = arith.constant 0 : index
    %c0_2 = arith.constant 0 : index
    %1 = vector.load %arg2[%c0_1, %c0_2] : memref<32x32xf32, #tpu.memory_space<vmem>>, vector<32x32xf32>
    %c0_3 = arith.constant 0 : index
    %c0_4 = arith.constant 0 : index
    %2 = vector.load %arg3[%c0_3, %c0_4] : memref<1x32xf32, #tpu.memory_space<vmem>>, vector<1x32xf32>
    %c0_5 = arith.constant 0 : index
    %c0_6 = arith.constant 0 : index
    %3 = vector.load %arg0[%c0_5, %c0_6] : memref<16x32xf32, #tpu.memory_space<vmem>>, vector<16x32xf32>
    %cst = arith.constant dense<0.000000e+00> : vector<16x32xf32>
    %4 = tpu.matmul %3, %0, %cst {dimension_numbers = #tpu.dot_dimension_numbers<[1], [0], [0], [1], [0, 0, 1, 1], [], []>} : vector<16x32xf32>, vector<32x32xf32>, vector<16x32xf32> -> vector<16x32xf32>
    %5 = vector.broadcast %2 : vector<1x32xf32> to vector<16x32xf32>
    %6 = arith.addf %4, %5 : vector<16x32xf32>
    %c0_7 = arith.constant 0 : index
    %c0_8 = arith.constant 0 : index
    %7 = vector.load %arg9[%c0_7, %c0_8] : memref<16x32xf32, #tpu.memory_space<vmem>>, vector<16x32xf32>
    tpu.vector_store %arg9[%c0_7, %c0_8], %6 {strides = array<i32>} : memref<16x32xf32, #tpu.memory_space<vmem>>, vector<16x32xf32>,
    %cst_9 = arith.constant 0.000000e+00 : f32
    %8 = vector.broadcast %cst_9 : f32 to vector<2x32xf32>
    %c0_i32 = arith.constant 0 : i32
    %c2_i32 = arith.constant 2 : i32
    %9 = arith.muli %c0_i32, %c2_i32 : i32
    %10 = tpu.assume_multiple %9, 2 : i32
    %11 = arith.index_cast %10 : i32 to index
    %c0_10 = arith.constant 0 : index
    %12 = vector.load %arg9[%11, %c0_10] : memref<16x32xf32, #tpu.memory_space<vmem>>, vector<2x32xf32>
    %cst_11 = arith.constant dense<0.000000e+00> : vector<2x32xf32>
    %13 = tpu.matmul %8, %1, %cst_11 {dimension_numbers = #tpu.dot_dimension_numbers<[1], [0], [0], [1], [0, 0, 1, 1], [], []>} : vector<2x32xf32>, vector<32x32xf32>, vector<2x32xf32> -> vector<2x32xf32>
    %14 = arith.addf %12, %13 : vector<2x32xf32>
    %15 = math.tanh %14 : vector<2x32xf32>
    %16 = arith.index_cast %10 : i32 to index
    %c0_12 = arith.constant 0 : index
    %17 = vector.load %arg8[%16, %c0_12] : memref<16x32xf32, #tpu.memory_space<vmem>>, vector<2x32xf32>
    tpu.vector_store %arg8[%16, %c0_12], %15 {strides = array<i32>} : memref<16x32xf32, #tpu.memory_space<vmem>>, vector<2x32xf32>,
    %c1_i32 = arith.constant 1 : i32
    %c2_i32_13 = arith.constant 2 : i32
    %18 = arith.muli %c1_i32, %c2_i32_13 : i32
    %19 = tpu.assume_multiple %18, 2 : i32
    %20 = arith.index_cast %19 : i32 to index
    %c0_14 = arith.constant 0 : index
    %21 = vector.load %arg9[%20, %c0_14] : memref<16x32xf32, #tpu.memory_space<vmem>>, vector<2x32xf32>
    %cst_15 = arith.constant dense<0.000000e+00> : vector<2x32xf32>
    %22 = tpu.matmul %15, %1, %cst_15 {dimension_numbers = #tpu.dot_dimension_numbers<[1], [0], [0], [1], [0, 0, 1, 1], [], []>} : vector<2x32xf32>, vector<32x32xf32>, vector<2x32xf32> -> vector<2x32xf32>
    %23 = arith.addf %21, %22 : vector<2x32xf32>
    %24 = math.tanh %23 : vector<2x32xf32>
    %25 = arith.index_cast %19 : i32 to index
    %c0_16 = arith.constant 0 : index
    %26 = vector.load %arg8[%25, %c0_16] : memref<16x32xf32, #tpu.memory_space<vmem>>, vector<2x32xf32>
    tpu.vector_store %arg8[%25, %c0_16], %24 {strides = array<i32>} : memref<16x32xf32, #tpu.memory_space<vmem>>, vector<2x32xf32>,
    %c2_i32_17 = arith.constant 2 : i32
    %c2_i32_18 = arith.constant 2 : i32
    %27 = arith.muli %c2_i32_17, %c2_i32_18 : i32
    %28 = tpu.assume_multiple %27, 2 : i32
    %29 = arith.index_cast %28 : i32 to index
    %c0_19 = arith.constant 0 : index
    %30 = vector.load %arg9[%29, %c0_19] : memref<16x32xf32, #tpu.memory_space<vmem>>, vector<2x32xf32>
    %cst_20 = arith.constant dense<0.000000e+00> : vector<2x32xf32>
    %31 = tpu.matmul %24, %1, %cst_20 {dimension_numbers = #tpu.dot_dimension_numbers<[1], [0], [0], [1], [0, 0, 1, 1], [], []>} : vector<2x32xf32>, vector<32x32xf32>, vector<2x32xf32> -> vector<2x32xf32>
    %32 = arith.addf %30, %31 : vector<2x32xf32>
    %33 = math.tanh %32 : vector<2x32xf32>
    %34 = arith.index_cast %28 : i32 to index
    %c0_21 = arith.constant 0 : index
    %35 = vector.load %arg8[%34, %c0_21] : memref<16x32xf32, #tpu.memory_space<vmem>>, vector<2x32xf32>
    tpu.vector_store %arg8[%34, %c0_21], %33 {strides = array<i32>} : memref<16x32xf32, #tpu.memory_space<vmem>>, vector<2x32xf32>,
    %c3_i32 = arith.constant 3 : i32
    %c2_i32_22 = arith.constant 2 : i32
    %36 = arith.muli %c3_i32, %c2_i32_22 : i32
    %37 = tpu.assume_multiple %36, 2 : i32
    %38 = arith.index_cast %37 : i32 to index
    %c0_23 = arith.constant 0 : index
    %39 = vector.load %arg9[%38, %c0_23] : memref<16x32xf32, #tpu.memory_space<vmem>>, vector<2x32xf32>
    %cst_24 = arith.constant dense<0.000000e+00> : vector<2x32xf32>
    %40 = tpu.matmul %33, %1, %cst_24 {dimension_numbers = #tpu.dot_dimension_numbers<[1], [0], [0], [1], [0, 0, 1, 1], [], []>} : vector<2x32xf32>, vector<32x32xf32>, vector<2x32xf32> -> vector<2x32xf32>
    %41 = arith.addf %39, %40 : vector<2x32xf32>
    %42 = math.tanh %41 : vector<2x32xf32>
    %43 = arith.index_cast %37 : i32 to index
    %c0_25 = arith.constant 0 : index
    %44 = vector.load %arg8[%43, %c0_25] : memref<16x32xf32, #tpu.memory_space<vmem>>, vector<2x32xf32>
    tpu.vector_store %arg8[%43, %c0_25], %42 {strides = array<i32>} : memref<16x32xf32, #tpu.memory_space<vmem>>, vector<2x32xf32>,
    %c4_i32 = arith.constant 4 : i32
    %c2_i32_26 = arith.constant 2 : i32
    %45 = arith.muli %c4_i32, %c2_i32_26 : i32
    %46 = tpu.assume_multiple %45, 2 : i32
    %47 = arith.index_cast %46 : i32 to index
    %c0_27 = arith.constant 0 : index
    %48 = vector.load %arg9[%47, %c0_27] : memref<16x32xf32, #tpu.memory_space<vmem>>, vector<2x32xf32>
    %cst_28 = arith.constant dense<0.000000e+00> : vector<2x32xf32>
    %49 = tpu.matmul %42, %1, %cst_28 {dimension_numbers = #tpu.dot_dimension_numbers<[1], [0], [0], [1], [0, 0, 1, 1], [], []>} : vector<2x32xf32>, vector<32x32xf32>, vector<2x32xf32> -> vector<2x32xf32>
    %50 = arith.addf %48, %49 : vector<2x32xf32>
    %51 = math.tanh %50 : vector<2x32xf32>
    %52 = arith.index_cast %46 : i32 to index
    %c0_29 = arith.constant 0 : index
    %53 = vector.load %arg8[%52, %c0_29] : memref<16x32xf32, #tpu.memory_space<vmem>>, vector<2x32xf32>
    tpu.vector_store %arg8[%52, %c0_29], %51 {strides = array<i32>} : memref<16x32xf32, #tpu.memory_space<vmem>>, vector<2x32xf32>,
    %c5_i32 = arith.constant 5 : i32
    %c2_i32_30 = arith.constant 2 : i32
    %54 = arith.muli %c5_i32, %c2_i32_30 : i32
    %55 = tpu.assume_multiple %54, 2 : i32
    %56 = arith.index_cast %55 : i32 to index
    %c0_31 = arith.constant 0 : index
    %57 = vector.load %arg9[%56, %c0_31] : memref<16x32xf32, #tpu.memory_space<vmem>>, vector<2x32xf32>
    %cst_32 = arith.constant dense<0.000000e+00> : vector<2x32xf32>
    %58 = tpu.matmul %51, %1, %cst_32 {dimension_numbers = #tpu.dot_dimension_numbers<[1], [0], [0], [1], [0, 0, 1, 1], [], []>} : vector<2x32xf32>, vector<32x32xf32>, vector<2x32xf32> -> vector<2x32xf32>
    %59 = arith.addf %57, %58 : vector<2x32xf32>
    %60 = math.tanh %59 : vector<2x32xf32>
    %61 = arith.index_cast %55 : i32 to index
    %c0_33 = arith.constant 0 : index
    %62 = vector.load %arg8[%61, %c0_33] : memref<16x32xf32, #tpu.memory_space<vmem>>, vector<2x32xf32>
    tpu.vector_store %arg8[%61, %c0_33], %60 {strides = array<i32>} : memref<16x32xf32, #tpu.memory_space<vmem>>, vector<2x32xf32>,
    %c6_i32 = arith.constant 6 : i32
    %c2_i32_34 = arith.constant 2 : i32
    %63 = arith.muli %c6_i32, %c2_i32_34 : i32
    %64 = tpu.assume_multiple %63, 2 : i32
    %65 = arith.index_cast %64 : i32 to index
    %c0_35 = arith.constant 0 : index
    %66 = vector.load %arg9[%65, %c0_35] : memref<16x32xf32, #tpu.memory_space<vmem>>, vector<2x32xf32>
    %cst_36 = arith.constant dense<0.000000e+00> : vector<2x32xf32>
    %67 = tpu.matmul %60, %1, %cst_36 {dimension_numbers = #tpu.dot_dimension_numbers<[1], [0], [0], [1], [0, 0, 1, 1], [], []>} : vector<2x32xf32>, vector<32x32xf32>, vector<2x32xf32> -> vector<2x32xf32>
    %68 = arith.addf %66, %67 : vector<2x32xf32>
    %69 = math.tanh %68 : vector<2x32xf32>
    %70 = arith.index_cast %64 : i32 to index
    %c0_37 = arith.constant 0 : index
    %71 = vector.load %arg8[%70, %c0_37] : memref<16x32xf32, #tpu.memory_space<vmem>>, vector<2x32xf32>
    tpu.vector_store %arg8[%70, %c0_37], %69 {strides = array<i32>} : memref<16x32xf32, #tpu.memory_space<vmem>>, vector<2x32xf32>,
    %c7_i32 = arith.constant 7 : i32
    %c2_i32_38 = arith.constant 2 : i32
    %72 = arith.muli %c7_i32, %c2_i32_38 : i32
    %73 = tpu.assume_multiple %72, 2 : i32
    %74 = arith.index_cast %73 : i32 to index
    %c0_39 = arith.constant 0 : index
    %75 = vector.load %arg9[%74, %c0_39] : memref<16x32xf32, #tpu.memory_space<vmem>>, vector<2x32xf32>
    %cst_40 = arith.constant dense<0.000000e+00> : vector<2x32xf32>
    %76 = tpu.matmul %69, %1, %cst_40 {dimension_numbers = #tpu.dot_dimension_numbers<[1], [0], [0], [1], [0, 0, 1, 1], [], []>} : vector<2x32xf32>, vector<32x32xf32>, vector<2x32xf32> -> vector<2x32xf32>
    %77 = arith.addf %75, %76 : vector<2x32xf32>
    %78 = math.tanh %77 : vector<2x32xf32>
    %79 = arith.index_cast %73 : i32 to index
    %c0_41 = arith.constant 0 : index
    %80 = vector.load %arg8[%79, %c0_41] : memref<16x32xf32, #tpu.memory_space<vmem>>, vector<2x32xf32>
    tpu.vector_store %arg8[%79, %c0_41], %78 {strides = array<i32>} : memref<16x32xf32, #tpu.memory_space<vmem>>, vector<2x32xf32>,
    %c8_i32 = arith.constant 8 : i32
    %c0_42 = arith.constant 0 : index
    %c0_43 = arith.constant 0 : index
    %81 = vector.load %arg4[%c0_42, %c0_43] : memref<32x32xf32, #tpu.memory_space<vmem>>, vector<32x32xf32>
    %c0_44 = arith.constant 0 : index
    %c0_45 = arith.constant 0 : index
    %82 = vector.load %arg5[%c0_44, %c0_45] : memref<32x32xf32, #tpu.memory_space<vmem>>, vector<32x32xf32>
    %c0_46 = arith.constant 0 : index
    %c0_47 = arith.constant 0 : index
    %83 = vector.load %arg6[%c0_46, %c0_47] : memref<1x32xf32, #tpu.memory_space<vmem>>, vector<1x32xf32>
    %c0_48 = arith.constant 0 : index
    %c0_49 = arith.constant 0 : index
    %84 = vector.load %arg8[%c0_48, %c0_49] : memref<16x32xf32, #tpu.memory_space<vmem>>, vector<16x32xf32>
    %cst_50 = arith.constant dense<0.000000e+00> : vector<16x32xf32>
    %85 = tpu.matmul %84, %81, %cst_50 {dimension_numbers = #tpu.dot_dimension_numbers<[1], [0], [0], [1], [0, 0, 1, 1], [], []>} : vector<16x32xf32>, vector<32x32xf32>, vector<16x32xf32> -> vector<16x32xf32>
    %86 = vector.broadcast %83 : vector<1x32xf32> to vector<16x32xf32>
    %87 = arith.addf %85, %86 : vector<16x32xf32>
    %c0_51 = arith.constant 0 : index
    %c0_52 = arith.constant 0 : index
    %88 = vector.load %arg9[%c0_51, %c0_52] : memref<16x32xf32, #tpu.memory_space<vmem>>, vector<16x32xf32>
    tpu.vector_store %arg9[%c0_51, %c0_52], %87 {strides = array<i32>} : memref<16x32xf32, #tpu.memory_space<vmem>>, vector<16x32xf32>,
    %cst_53 = arith.constant 0.000000e+00 : f32
    %89 = vector.broadcast %cst_53 : f32 to vector<2x32xf32>
    %c0_i32_54 = arith.constant 0 : i32
    %c2_i32_55 = arith.constant 2 : i32
    %90 = arith.muli %c0_i32_54, %c2_i32_55 : i32
    %91 = tpu.assume_multiple %90, 2 : i32
    %92 = arith.index_cast %91 : i32 to index
    %c0_56 = arith.constant 0 : index
    %93 = vector.load %arg9[%92, %c0_56] : memref<16x32xf32, #tpu.memory_space<vmem>>, vector<2x32xf32>
    %cst_57 = arith.constant dense<0.000000e+00> : vector<2x32xf32>
    %94 = tpu.matmul %89, %82, %cst_57 {dimension_numbers = #tpu.dot_dimension_numbers<[1], [0], [0], [1], [0, 0, 1, 1], [], []>} : vector<2x32xf32>, vector<32x32xf32>, vector<2x32xf32> -> vector<2x32xf32>
    %95 = arith.addf %93, %94 : vector<2x32xf32>
    %96 = math.tanh %95 : vector<2x32xf32>
    %97 = arith.index_cast %91 : i32 to index
    %c0_58 = arith.constant 0 : index
    %98 = vector.load %arg7[%97, %c0_58] : memref<16x32xf32, #tpu.memory_space<vmem>>, vector<2x32xf32>
    tpu.vector_store %arg7[%97, %c0_58], %96 {strides = array<i32>} : memref<16x32xf32, #tpu.memory_space<vmem>>, vector<2x32xf32>,
    %c1_i32_59 = arith.constant 1 : i32
    %c2_i32_60 = arith.constant 2 : i32
    %99 = arith.muli %c1_i32_59, %c2_i32_60 : i32
    %100 = tpu.assume_multiple %99, 2 : i32
    %101 = arith.index_cast %100 : i32 to index
    %c0_61 = arith.constant 0 : index
    %102 = vector.load %arg9[%101, %c0_61] : memref<16x32xf32, #tpu.memory_space<vmem>>, vector<2x32xf32>
    %cst_62 = arith.constant dense<0.000000e+00> : vector<2x32xf32>
    %103 = tpu.matmul %96, %82, %cst_62 {dimension_numbers = #tpu.dot_dimension_numbers<[1], [0], [0], [1], [0, 0, 1, 1], [], []>} : vector<2x32xf32>, vector<32x32xf32>, vector<2x32xf32> -> vector<2x32xf32>
    %104 = arith.addf %102, %103 : vector<2x32xf32>
    %105 = math.tanh %104 : vector<2x32xf32>
    %106 = arith.index_cast %100 : i32 to index
    %c0_63 = arith.constant 0 : index
    %107 = vector.load %arg7[%106, %c0_63] : memref<16x32xf32, #tpu.memory_space<vmem>>, vector<2x32xf32>
    tpu.vector_store %arg7[%106, %c0_63], %105 {strides = array<i32>} : memref<16x32xf32, #tpu.memory_space<vmem>>, vector<2x32xf32>,
    %c2_i32_64 = arith.constant 2 : i32
    %c2_i32_65 = arith.constant 2 : i32
    %108 = arith.muli %c2_i32_64, %c2_i32_65 : i32
    %109 = tpu.assume_multiple %108, 2 : i32
    %110 = arith.index_cast %109 : i32 to index
    %c0_66 = arith.constant 0 : index
    %111 = vector.load %arg9[%110, %c0_66] : memref<16x32xf32, #tpu.memory_space<vmem>>, vector<2x32xf32>
    %cst_67 = arith.constant dense<0.000000e+00> : vector<2x32xf32>
    %112 = tpu.matmul %105, %82, %cst_67 {dimension_numbers = #tpu.dot_dimension_numbers<[1], [0], [0], [1], [0, 0, 1, 1], [], []>} : vector<2x32xf32>, vector<32x32xf32>, vector<2x32xf32> -> vector<2x32xf32>
    %113 = arith.addf %111, %112 : vector<2x32xf32>
    %114 = math.tanh %113 : vector<2x32xf32>
    %115 = arith.index_cast %109 : i32 to index
    %c0_68 = arith.constant 0 : index
    %116 = vector.load %arg7[%115, %c0_68] : memref<16x32xf32, #tpu.memory_space<vmem>>, vector<2x32xf32>
    tpu.vector_store %arg7[%115, %c0_68], %114 {strides = array<i32>} : memref<16x32xf32, #tpu.memory_space<vmem>>, vector<2x32xf32>,
    %c3_i32_69 = arith.constant 3 : i32
    %c2_i32_70 = arith.constant 2 : i32
    %117 = arith.muli %c3_i32_69, %c2_i32_70 : i32
    %118 = tpu.assume_multiple %117, 2 : i32
    %119 = arith.index_cast %118 : i32 to index
    %c0_71 = arith.constant 0 : index
    %120 = vector.load %arg9[%119, %c0_71] : memref<16x32xf32, #tpu.memory_space<vmem>>, vector<2x32xf32>
    %cst_72 = arith.constant dense<0.000000e+00> : vector<2x32xf32>
    %121 = tpu.matmul %114, %82, %cst_72 {dimension_numbers = #tpu.dot_dimension_numbers<[1], [0], [0], [1], [0, 0, 1, 1], [], []>} : vector<2x32xf32>, vector<32x32xf32>, vector<2x32xf32> -> vector<2x32xf32>
    %122 = arith.addf %120, %121 : vector<2x32xf32>
    %123 = math.tanh %122 : vector<2x32xf32>
    %124 = arith.index_cast %118 : i32 to index
    %c0_73 = arith.constant 0 : index
    %125 = vector.load %arg7[%124, %c0_73] : memref<16x32xf32, #tpu.memory_space<vmem>>, vector<2x32xf32>
    tpu.vector_store %arg7[%124, %c0_73], %123 {strides = array<i32>} : memref<16x32xf32, #tpu.memory_space<vmem>>, vector<2x32xf32>,
    %c4_i32_74 = arith.constant 4 : i32
    %c2_i32_75 = arith.constant 2 : i32
    %126 = arith.muli %c4_i32_74, %c2_i32_75 : i32
    %127 = tpu.assume_multiple %126, 2 : i32
    %128 = arith.index_cast %127 : i32 to index
    %c0_76 = arith.constant 0 : index
    %129 = vector.load %arg9[%128, %c0_76] : memref<16x32xf32, #tpu.memory_space<vmem>>, vector<2x32xf32>
    %cst_77 = arith.constant dense<0.000000e+00> : vector<2x32xf32>
    %130 = tpu.matmul %123, %82, %cst_77 {dimension_numbers = #tpu.dot_dimension_numbers<[1], [0], [0], [1], [0, 0, 1, 1], [], []>} : vector<2x32xf32>, vector<32x32xf32>, vector<2x32xf32> -> vector<2x32xf32>
    %131 = arith.addf %129, %130 : vector<2x32xf32>
    %132 = math.tanh %131 : vector<2x32xf32>
    %133 = arith.index_cast %127 : i32 to index
    %c0_78 = arith.constant 0 : index
    %134 = vector.load %arg7[%133, %c0_78] : memref<16x32xf32, #tpu.memory_space<vmem>>, vector<2x32xf32>
    tpu.vector_store %arg7[%133, %c0_78], %132 {strides = array<i32>} : memref<16x32xf32, #tpu.memory_space<vmem>>, vector<2x32xf32>,
    %c5_i32_79 = arith.constant 5 : i32
    %c2_i32_80 = arith.constant 2 : i32
    %135 = arith.muli %c5_i32_79, %c2_i32_80 : i32
    %136 = tpu.assume_multiple %135, 2 : i32
    %137 = arith.index_cast %136 : i32 to index
    %c0_81 = arith.constant 0 : index
    %138 = vector.load %arg9[%137, %c0_81] : memref<16x32xf32, #tpu.memory_space<vmem>>, vector<2x32xf32>
    %cst_82 = arith.constant dense<0.000000e+00> : vector<2x32xf32>
    %139 = tpu.matmul %132, %82, %cst_82 {dimension_numbers = #tpu.dot_dimension_numbers<[1], [0], [0], [1], [0, 0, 1, 1], [], []>} : vector<2x32xf32>, vector<32x32xf32>, vector<2x32xf32> -> vector<2x32xf32>
    %140 = arith.addf %138, %139 : vector<2x32xf32>
    %141 = math.tanh %140 : vector<2x32xf32>
    %142 = arith.index_cast %136 : i32 to index
    %c0_83 = arith.constant 0 : index
    %143 = vector.load %arg7[%142, %c0_83] : memref<16x32xf32, #tpu.memory_space<vmem>>, vector<2x32xf32>
    tpu.vector_store %arg7[%142, %c0_83], %141 {strides = array<i32>} : memref<16x32xf32, #tpu.memory_space<vmem>>, vector<2x32xf32>,
    %c6_i32_84 = arith.constant 6 : i32
    %c2_i32_85 = arith.constant 2 : i32
    %144 = arith.muli %c6_i32_84, %c2_i32_85 : i32
    %145 = tpu.assume_multiple %144, 2 : i32
    %146 = arith.index_cast %145 : i32 to index
    %c0_86 = arith.constant 0 : index
    %147 = vector.load %arg9[%146, %c0_86] : memref<16x32xf32, #tpu.memory_space<vmem>>, vector<2x32xf32>
    %cst_87 = arith.constant dense<0.000000e+00> : vector<2x32xf32>
    %148 = tpu.matmul %141, %82, %cst_87 {dimension_numbers = #tpu.dot_dimension_numbers<[1], [0], [0], [1], [0, 0, 1, 1], [], []>} : vector<2x32xf32>, vector<32x32xf32>, vector<2x32xf32> -> vector<2x32xf32>
    %149 = arith.addf %147, %148 : vector<2x32xf32>
    %150 = math.tanh %149 : vector<2x32xf32>
    %151 = arith.index_cast %145 : i32 to index
    %c0_88 = arith.constant 0 : index
    %152 = vector.load %arg7[%151, %c0_88] : memref<16x32xf32, #tpu.memory_space<vmem>>, vector<2x32xf32>
    tpu.vector_store %arg7[%151, %c0_88], %150 {strides = array<i32>} : memref<16x32xf32, #tpu.memory_space<vmem>>, vector<2x32xf32>,
    %c7_i32_89 = arith.constant 7 : i32
    %c2_i32_90 = arith.constant 2 : i32
    %153 = arith.muli %c7_i32_89, %c2_i32_90 : i32
    %154 = tpu.assume_multiple %153, 2 : i32
    %155 = arith.index_cast %154 : i32 to index
    %c0_91 = arith.constant 0 : index
    %156 = vector.load %arg9[%155, %c0_91] : memref<16x32xf32, #tpu.memory_space<vmem>>, vector<2x32xf32>
    %cst_92 = arith.constant dense<0.000000e+00> : vector<2x32xf32>
    %157 = tpu.matmul %150, %82, %cst_92 {dimension_numbers = #tpu.dot_dimension_numbers<[1], [0], [0], [1], [0, 0, 1, 1], [], []>} : vector<2x32xf32>, vector<32x32xf32>, vector<2x32xf32> -> vector<2x32xf32>
    %158 = arith.addf %156, %157 : vector<2x32xf32>
    %159 = math.tanh %158 : vector<2x32xf32>
    %160 = arith.index_cast %154 : i32 to index
    %c0_93 = arith.constant 0 : index
    %161 = vector.load %arg7[%160, %c0_93] : memref<16x32xf32, #tpu.memory_space<vmem>>, vector<2x32xf32>
    tpu.vector_store %arg7[%160, %c0_93], %159 {strides = array<i32>} : memref<16x32xf32, #tpu.memory_space<vmem>>, vector<2x32xf32>,
    %c8_i32_94 = arith.constant 8 : i32
    return
  }
}

</mosaic_0001>

<bundles_post_ra>
// kernel: tpu_custom_call.1
= control target key start
LH: loop header
LB: loop body
LE: loop exit
PB: predicated region body
PF: predicated region fallthrough
CT: control target
= control target key end

     0   :  { %12 = vsyncpa [#allocation5], 0  ;;  %s2476_s0 = inlined_call_operand.hbm [shape: f32[16,32], index: 0, kind: input, shape index: {}]   ;;  %s2477_s1 = inlined_call_operand.hbm [shape: f32[32,32], index: 1, kind: input, shape index: {}]   ;;  %s2478_s2 = inlined_call_operand.hbm [shape: f32[32,32], index: 2, kind: input, shape index: {}]   ;;  %s2479_s3 = inlined_call_operand.vmem [shape: f32[1,32], index: 3, kind: input, shape index: {}]   ;;  %s2480_s4 = inlined_call_operand.hbm [shape: f32[32,32], index: 4, kind: input, shape index: {}]   ;;  %s2481_s5 = inlined_call_operand.hbm [shape: f32[32,32], index: 5, kind: input, shape index: {}]   ;;  %s2482_s6 = inlined_call_operand.vmem [shape: f32[1,32], index: 6, kind: input, shape index: {}]   ;;  %s2483_s7 = inlined_call_operand.hbm [shape: f32[16,32], index: 7, kind: output, shape index: {}]  }
   0x1   :  { %13 = vsyncpa [#allocation8], 0 }
   0x2   :  { %14 = vsyncpa [#allocation11], 0 }
   0x3   :  { %15 = vsyncpa [#allocation6], 0  ;;  %s2171_s24 = smov [#allocation7]   ;;  %s2172_s26 = smov [#allocation10]  }
   0x4   :  { %s33_s25 = sshll.u32 %s2171_s24, 4  ;;  %s59_s27 = sshll.u32 %s2172_s26, 4  ;;  %s34_s25 = int_to_ptr.vmem [resolvable:$true] %s33_s25  ;;  %s2222_s27 = int_to_ptr.vmem [resolvable:$true] %s59_s27 }
   0x5   :  { %s2031_s30 = scalar_lea.hbm %s2477_s1, 512 }
   0x6   :  { %p2032_p0 = scmp.ne.s32.totalorder %s2477_s1, %s2031_s30  ;;  %p2035_p1 = scmp.lt.u32.totalorder %s2031_s30, %s2477_s1 }
   0x8   :  { %p2037_p2 = pnand %p2035_p1, %p2032_p0 }
   0xa   :  { %2040 = shalt.err (!%p2037_p2)
}
   0xb   :  { %s2041_s12 = scalar_lea.vmem %s34_s25, 512  ;;  %p2046_p4 = scmp.lt.s32.totalorder %s34_s25, %s34_s25 }
   0xc   :  { %p2042_p3 = scmp.ne.s32.totalorder %s34_s25, %s2041_s12  ;;  %p2047_p5 = scmp.lt.s32.totalorder %s2041_s12, %s2041_s12 }
   0xe   :  { %p2048_p6 = por %p2047_p5, %p2046_p4 }
  0x10   :  { %p2049_p7 = pnand %p2048_p6, %p2042_p3 }
  0x12   :  { %2052 = shalt.err (!%p2049_p7)
}
  0x13   :  { %s2173_s13 = smov 128   ;;  %s2174_s14 = smov 8  }
  0x14   :  { %39 = dma.hbm_to_vmem [thread:$0]  %s2477_s1, 512, %s34_s25, [#allocation8], %s2173_s13, %s2173_s13, %s2174_s14  }
  0x15   :  { %s2053_s19 = scalar_lea.hbm %s2480_s4, 512 }
  0x16   :  { %p2054_p8 = scmp.ne.s32.totalorder %s2480_s4, %s2053_s19  ;;  %p2057_p9 = scmp.lt.u32.totalorder %s2053_s19, %s2480_s4 }
  0x18   :  { %p2059_p10 = pnand %p2057_p9, %p2054_p8 }
  0x1a   :  { %2062 = shalt.err (!%p2059_p10)
}
  0x1b   :  { %s2063_s24 = scalar_lea.vmem %s2222_s27, 512  ;;  %p2068_p12 = scmp.lt.s32.totalorder %s2222_s27, %s2222_s27 }
  0x1c   :  { %p2064_p11 = scmp.ne.s32.totalorder %s2222_s27, %s2063_s24  ;;  %p2069_p13 = scmp.lt.s32.totalorder %s2063_s24, %s2063_s24 }
  0x1e   :  { %p2070_p0 = por %p2069_p13, %p2068_p12 }
  0x20   :  { %p2071_p1 = pnand %p2070_p0, %p2064_p11 }
  0x22   :  { %2074 = shalt.err (!%p2071_p1)
}
  0x23   :  { %65 = dma.hbm_to_vmem [thread:$0]  %s2480_s4, 512, %s2222_s27, [#allocation11], %s2173_s13, %s2173_s13, %s2174_s14  }
  0x24   :  { %s2175_s26 = smov [#allocation4]   ;;  %s2176_s29 = smov [#allocation9]  }
  0x25   :  { %s21_s28 = sshll.u32 %s2175_s26, 4  ;;  %s45_s30 = sshll.u32 %s2176_s29, 4  ;;  %s22_s28 = int_to_ptr.vmem [resolvable:$true] %s21_s28  ;;  %s2259_s30 = int_to_ptr.vmem [resolvable:$true] %s45_s30 }
  0x26   :  { %s2075_s10 = scalar_lea.hbm %s2476_s0, 256 }
  0x27   :  { %p2076_p2 = scmp.ne.s32.totalorder %s2476_s0, %s2075_s10  ;;  %p2079_p3 = scmp.lt.u32.totalorder %s2075_s10, %s2476_s0 }
  0x29   :  { %p2081_p4 = pnand %p2079_p3, %p2076_p2 }
  0x2b   :  { %2084 = shalt.err (!%p2081_p4)
}
  0x2c   :  { %s2085_s4 = scalar_lea.vmem %s22_s28, 256  ;;  %p2090_p6 = scmp.lt.s32.totalorder %s22_s28, %s22_s28 }
  0x2d   :  { %p2086_p5 = scmp.ne.s32.totalorder %s22_s28, %s2085_s4  ;;  %p2091_p7 = scmp.lt.s32.totalorder %s2085_s4, %s2085_s4 }
  0x2f   :  { %p2092_p8 = por %p2091_p7, %p2090_p6 }
  0x31   :  { %p2093_p9 = pnand %p2092_p8, %p2086_p5 }
  0x33   :  { %2096 = shalt.err (!%p2093_p9)
}
  0x34   :  { %27 = dma.hbm_to_vmem [thread:$0]  %s2476_s0, 256, %s22_s28, [#allocation5], %s2173_s13, %s2173_s13, %s2174_s14  }
  0x35   :  { %s2097_s20 = scalar_lea.hbm %s2478_s2, 512 }
  0x36   :  { %p2098_p10 = scmp.ne.s32.totalorder %s2478_s2, %s2097_s20  ;;  %p2101_p11 = scmp.lt.u32.totalorder %s2097_s20, %s2478_s2 }
  0x38   :  { %p2103_p12 = pnand %p2101_p11, %p2098_p10 }
  0x3a   :  { %2106 = shalt.err (!%p2103_p12)
}
  0x3b   :  { %s2107_s1 = scalar_lea.vmem %s2259_s30, 512  ;;  %p2112_p0 = scmp.lt.s32.totalorder %s2259_s30, %s2259_s30 }
  0x3c   :  { %p2108_p13 = scmp.ne.s32.totalorder %s2259_s30, %s2107_s1  ;;  %p2113_p1 = scmp.lt.s32.totalorder %s2107_s1, %s2107_s1 }
  0x3e   :  { %p2114_p2 = por %p2113_p1, %p2112_p0 }
  0x40   :  { %p2115_p3 = pnand %p2114_p2, %p2108_p13 }
  0x42   :  { %2118 = shalt.err (!%p2115_p3)
}
  0x43   :  { %51 = dma.hbm_to_vmem [thread:$0]  %s2478_s2, 512, %s2259_s30, [#allocation8], %s2173_s13, %s2173_s13, %s2174_s14  }
  0x44   :  { %s2177_s26 = smov [#allocation12]   ;;  %s2119_s9 = scalar_lea.hbm %s2481_s5, 512 }
  0x45   :  { %s71_s28 = sshll.u32 %s2177_s26, 4  ;;  %p2120_p4 = scmp.ne.s32.totalorder %s2481_s5, %s2119_s9  ;;  %s72_s28 = int_to_ptr.vmem [resolvable:$true] %s71_s28 }
  0x46   :  { %p2123_p5 = scmp.lt.u32.totalorder %s2119_s9, %s2481_s5 }
  0x48   :  { %p2125_p6 = pnand %p2123_p5, %p2120_p4 }
  0x4a   :  { %2128 = shalt.err (!%p2125_p6)
}
  0x4b   :  { %s2129_s16 = scalar_lea.vmem %s72_s28, 512  ;;  %p2134_p8 = scmp.lt.s32.totalorder %s72_s28, %s72_s28 }
  0x4c   :  { %p2130_p7 = scmp.ne.s32.totalorder %s72_s28, %s2129_s16  ;;  %p2135_p9 = scmp.lt.s32.totalorder %s2129_s16, %s2129_s16 }
  0x4e   :  { %p2136_p10 = por %p2135_p9, %p2134_p8 }
  0x50   :  { %p2137_p11 = pnand %p2136_p10, %p2130_p7 }
  0x52   :  { %2140 = shalt.err (!%p2137_p11)
}
  0x53   :  { %77 = dma.hbm_to_vmem [thread:$0]  %s2481_s5, 512, %s72_s28, [#allocation11], %s2173_s13, %s2173_s13, %s2174_s14  }
  0x54   :  { %2163 = dma.done.wait [#allocation5], 256  }
  0x55   :  { %2164 = vsyncadd [#allocation5], 4294967040 }
  0x56   :  { %2165 = dma.done.wait [#allocation8], 1024  }
  0x57   :  { %2166 = vsyncadd [#allocation8], 4294966272 }
  0x58   :  { %2167 = dma.done.wait [#allocation11], 1024  }
  0x59   :  { %2168 = vsyncadd [#allocation11], 4294966272  ;;  %v2178_v0 = vmov 0.0|0.0   ;;  %vm2179_vm0 = vmmov 0   ;;  %v2180_v1 = vmov 0.0   ;;  %vm112_vm1 = vcmask 261120  }
  0x5a   :  { %1884 = vmatprep.subr.bf16.mxu1 %v2178_v0  ;;  %1697 = vmatprep.mubr.msk.f32.mxu1 %vm2179_vm0, %v2180_v1  ;;  %v95_v2 = vld [vmem:[#allocation7] sm:$0xff]  ;;  %v96_v3 = vld [vmem:[#allocation7 + $0x8] sm:$0xff]  ;;  %v97_v4 = vld [vmem:[#allocation7 + $0x10] sm:$0xff]  ;;  %vm272_vm2 = vcmask 254976  }
  0x5b   :  { %v1876_v5 = vpack.c.bf16 %v96_v3, %v95_v2  ;;  %v98_v6 = vld [vmem:[#allocation7 + $0x18] sm:$0xff]  ;;  %v104_v7 = vld [vmem:[#allocation4] sm:$0xff]  ;;  %v99_v9 = vld [vmem:[#allocation9] sm:$0xff] }
  0x5c   :  { %v1880_v8 = vpack.c.bf16 %v98_v6, %v97_v4  ;;  %1686 = vmatprep.mubr.msk.f32.mxu0 %vm112_vm1, %v104_v7  ;;  %v100_v10 = vld [vmem:[#allocation9 + $0x8] sm:$0xff]  ;;  %v101_v11 = vld [vmem:[#allocation9 + $0x10] sm:$0xff]  ;;  %v102_v13 = vld [vmem:[#allocation9 + $0x18] sm:$0xff] }
  0x5d   :  { %1877 = vmatprep.subr.bf16.mxu0 %v1876_v5  ;;  %v2315_v12 = vpack.c.bf16 %v100_v10, %v99_v9  ;;  %v2318_v14 = vpack.c.bf16 %v102_v13, %v101_v11  ;;  %v105_v15 = vld [vmem:[#allocation4 + $0x8] sm:$0xff]  ;;  %v1566_v16 = vld [vmem:[%s2479_s3] ss:$0 sm:$0xff]  ;;  %v827_v57 = vld [vmem:[#allocation10] sm:$0xff] }
  0x5e   :  { %1879 = vmatpush3.bf16.msra.mxu0 %v1876_v5  ;;  %v828_v58 = vld [vmem:[#allocation10 + $0x8] sm:$0xff]  ;;  %v829_v60 = vld [vmem:[#allocation10 + $0x10] sm:$0xff]  ;;  %v830_v61 = vld [vmem:[#allocation10 + $0x18] sm:$0xff] }
  0x5f   :  { %1881 = vmatprep.subr.bf16.mxu0 %v1880_v8  ;;  %1886 = vmatpush3.bf16.msra.mxu1 %v2315_v12  ;;  %v1932_v59 = vpack.c.bf16 %v828_v58, %v827_v57  ;;  %v1936_v62 = vpack.c.bf16 %v830_v61, %v829_v60  ;;  %v831_v63 = vld [vmem:[#allocation12] sm:$0xff]  ;;  %v832_v2 = vld [vmem:[#allocation12 + $0x8] sm:$0xff]  ;;  %v833_v3 = vld [vmem:[#allocation12 + $0x10] sm:$0xff] }
  0x60   :  { %1887 = vmatprep.subr.bf16.mxu1 %v2178_v0  ;;  %v2390_v4 = vpack.c.bf16 %v832_v2, %v831_v63  ;;  %v834_v5 = vld [vmem:[#allocation12 + $0x18] sm:$0xff] }
  0x61   :  { %v2393_v6 = vpack.c.bf16 %v834_v5, %v833_v3 }
  0x62   :  { %1883 = vmatpush3.bf16.msra.mxu0 %v1880_v8 }
  0x63   :  { %1889 = vmatpush3.bf16.msra.mxu1 %v2318_v14  ;;  %1890 = vmatprep.subr.bf16.mxu0 %v2178_v0 }
  0x64   :  { %1896 = vmatprep.subr.bf16.mxu1 %v2178_v0 }
  0x65   :  { %1687 = vmatmul.mubr.msk.f32.vlgmr.msra.gmra.mrb[0].mxu0 %vm112_vm1, %v105_v15  ;;  %v1576_v15 = vld [vmem:[%s2482_s6] ss:$0 sm:$0xff]  ;;  %s2181_s6 = smov [#allocation13]  }
  0x66   :  { %1698 = vmatmul.mubr.f32.vlgmr.msra.gmra.mrb[0].mxu1 %v2180_v1  ;;  %1892 = vmatpush3.bf16.msra.mxu0 %v2315_v12  ;;  %s1552_s17 = sshll.u32 %s2181_s6, 4  ;;  %s1553_s17 = int_to_ptr.vmem [resolvable:$true] %s1552_s17 }
  0x67   :  { %1893 = vmatprep.subr.bf16.mxu0 %v2178_v0  ;;  %1708 = vmatprep.mubr.msk.f32.mxu0 %vm2179_vm0, %v2180_v1  ;;  %s2141_s18 = scalar_lea.vmem %s1553_s17, 256  ;;  %p2146_p13 = scmp.lt.s32.totalorder %s1553_s17, %s1553_s17 }
  0x68   :  { %1898 = vmatpush3.bf16.msra.mxu1 %v2315_v12  ;;  %1719 = vmatprep.mubr.msk.f32.mxu1 %vm2179_vm0, %v2180_v1  ;;  %p2142_p12 = scmp.ne.s32.totalorder %s1553_s17, %s2141_s18  ;;  %p2147_p0 = scmp.lt.s32.totalorder %s2141_s18, %s2141_s18 }
  0x69   :  { %1899 = vmatprep.subr.bf16.mxu1 %v2178_v0 }
  0x6a   :  { %1895 = vmatpush3.bf16.msra.mxu0 %v2318_v14  ;;  %p2148_p1 = por %p2147_p0, %p2146_p13 }
  0x6b   :  { %1902 = vmatprep.subr.bf16.mxu0 %v2178_v0 }
  0x6c   :  { %1901 = vmatpush3.bf16.msra.mxu1 %v2318_v14  ;;  %p2149_p2 = pnand %p2148_p1, %p2142_p12 }
  0x6d   :  { %1908 = vmatprep.subr.bf16.mxu1 %v2178_v0 }
 0x138   :  { %v1688_v17 = vpop.f32.mrb[0].mxu0 }
 0x139   :  { %v191_v18 = vadd.f32 %v1688_v17, %v1566_v16  ;;  %v185_v19 = vpop.f32.mrb[1].mxu0  ;;  %v266_v20 = vpop.f32.mrb[0].mxu1 }
 0x13a   :  { %v186_v21 = vadd.f32 %v1566_v16, %v185_v19  ;;  %v1699_v22 = vpop.f32.mrb[1].mxu1 }
 0x13b   :  { %195 = vst.msk [vmem:[#allocation3 + $0x8] sm:$0xff] %vm112_vm1, %v191_v18 }
 0x13c   :  { %194 = vst.msk [vmem:[#allocation3] sm:$0xff] %vm112_vm1, %v186_v21 }
 0x142   :  { %v512_v41 = vld [vmem:[#allocation3 + $0x8] sm:$0x3]  ;;  %v591_v46 = vld [vmem:[#allocation3 + $0xa] sm:$0x3]  ;;  %v670_v52 = vld [vmem:[#allocation3 + $0xc] sm:$0x3] }
 0x143   :  { %v196_v23 = vld [vmem:[#allocation3] sm:$0x3]  ;;  %v275_v26 = vld [vmem:[#allocation3 + $0x2] sm:$0x3]  ;;  %v354_v31 = vld [vmem:[#allocation3 + $0x4] sm:$0x3] }
 0x144   :  { %v270_v24 = vadd.f32 %v266_v20, %v196_v23  ;;  %v433_v36 = vld [vmem:[#allocation3 + $0x6] sm:$0x3]  ;;  %v749_v7 = vld [vmem:[#allocation3 + $0xe] sm:$0x3] }
 0x146   :  { %1999 = vtanh.f32 %v270_v24 }
 0x150   :  { %v2000_v25 = vpop.eup %1999 }
 0x151   :  { %273 = vst.msk [vmem:[#allocation2] sm:$0x3] %vm272_vm2, %v2000_v25  ;;  %1709 = vmatmul.mubr.msk.f32.vlgmr.msra.gmra.mrb[2].mxu0 %vm112_vm1, %v2000_v25 }
 0x152   :  { %1904 = vmatpush3.bf16.msra.mxu0 %v2315_v12  ;;  %1730 = vmatprep.mubr.msk.f32.mxu0 %vm2179_vm0, %v2180_v1 }
 0x153   :  { %1905 = vmatprep.subr.bf16.mxu0 %v2178_v0 }
 0x156   :  { %1907 = vmatpush3.bf16.msra.mxu0 %v2318_v14 }
 0x157   :  { %1914 = vmatprep.subr.bf16.mxu0 %v2178_v0 }
 0x224   :  { %v345_v27 = vpop.f32.mrb[2].mxu0 }
 0x225   :  { %v349_v28 = vadd.f32 %v345_v27, %v275_v26  ;;  %v1710_v29 = vpop.f32.mrb[3].mxu0 }
 0x227   :  { %2001 = vtanh.f32 %v349_v28 }
 0x231   :  { %v2002_v30 = vpop.eup %2001 }
 0x232   :  { %352 = vst.msk [vmem:[#allocation2 + $0x2] sm:$0x3] %vm272_vm2, %v2002_v30  ;;  %1720 = vmatmul.mubr.msk.f32.vlgmr.msra.gmra.mrb[2].mxu1 %vm112_vm1, %v2002_v30 }
 0x233   :  { %1910 = vmatpush3.bf16.msra.mxu1 %v2315_v12  ;;  %1741 = vmatprep.mubr.msk.f32.mxu1 %vm2179_vm0, %v2180_v1 }
 0x234   :  { %1911 = vmatprep.subr.bf16.mxu1 %v2178_v0 }
 0x237   :  { %1913 = vmatpush3.bf16.msra.mxu1 %v2318_v14 }
 0x238   :  { %1920 = vmatprep.subr.bf16.mxu1 %v2178_v0 }
 0x305   :  { %v424_v32 = vpop.f32.mrb[2].mxu1 }
 0x306   :  { %v428_v33 = vadd.f32 %v424_v32, %v354_v31  ;;  %v1721_v34 = vpop.f32.mrb[3].mxu1 }
 0x308   :  { %2003 = vtanh.f32 %v428_v33 }
 0x312   :  { %v2004_v35 = vpop.eup %2003 }
 0x313   :  { %431 = vst.msk [vmem:[#allocation2 + $0x4] sm:$0x3] %vm272_vm2, %v2004_v35  ;;  %1731 = vmatmul.mubr.msk.f32.vlgmr.msra.gmra.mrb[4].mxu0 %vm112_vm1, %v2004_v35 }
 0x314   :  { %1916 = vmatpush3.bf16.msra.mxu0 %v2315_v12  ;;  %1752 = vmatprep.mubr.msk.f32.mxu0 %vm2179_vm0, %v2180_v1 }
 0x315   :  { %1917 = vmatprep.subr.bf16.mxu0 %v2178_v0 }
 0x318   :  { %1919 = vmatpush3.bf16.msra.mxu0 %v2318_v14 }
 0x319   :  { %1926 = vmatprep.subr.bf16.mxu0 %v2178_v0 }
 0x3e6   :  { %v503_v37 = vpop.f32.mrb[4].mxu0 }
 0x3e7   :  { %v507_v38 = vadd.f32 %v503_v37, %v433_v36  ;;  %v1732_v39 = vpop.f32.mrb[5].mxu0 }
 0x3e9   :  { %2005 = vtanh.f32 %v507_v38 }
 0x3f3   :  { %v2006_v40 = vpop.eup %2005 }
 0x3f4   :  { %510 = vst.msk [vmem:[#allocation2 + $0x6] sm:$0x3] %vm272_vm2, %v2006_v40  ;;  %1742 = vmatmul.mubr.msk.f32.vlgmr.msra.gmra.mrb[4].mxu1 %vm112_vm1, %v2006_v40 }
 0x3f5   :  { %1922 = vmatpush3.bf16.msra.mxu1 %v2315_v12  ;;  %1763 = vmatprep.mubr.msk.f32.mxu1 %vm2179_vm0, %v2180_v1 }
 0x3f6   :  { %1923 = vmatprep.subr.bf16.mxu1 %v2178_v0 }
 0x3f9   :  { %1925 = vmatpush3.bf16.msra.mxu1 %v2318_v14 }
 0x3fa   :  { %1933 = vmatprep.subr.bf16.mxu1 %v1932_v59 }
 0x3fb   :  { %v836_v51 = vld [vmem:[#allocation2] sm:$0xff] }
 0x4c7   :  { %v582_v42 = vpop.f32.mrb[4].mxu1 }
 0x4c8   :  { %v586_v43 = vadd.f32 %v582_v42, %v512_v41  ;;  %v1743_v44 = vpop.f32.mrb[5].mxu1 }
 0x4ca   :  { %2007 = vtanh.f32 %v586_v43 }
 0x4d4   :  { %v2008_v45 = vpop.eup %2007 }
 0x4d5   :  { %589 = vst.msk [vmem:[#allocation2 + $0x8] sm:$0x3] %vm272_vm2, %v2008_v45  ;;  %1753 = vmatmul.mubr.msk.f32.vlgmr.msra.gmra.mrb[6].mxu0 %vm112_vm1, %v2008_v45 }
 0x4d6   :  { %1928 = vmatpush3.bf16.msra.mxu0 %v2315_v12  ;;  %1774 = vmatprep.mubr.msk.f32.mxu0 %vm2179_vm0, %v2180_v1 }
 0x4d7   :  { %1929 = vmatprep.subr.bf16.mxu0 %v2178_v0 }
 0x4da   :  { %1931 = vmatpush3.bf16.msra.mxu0 %v2318_v14 }
 0x4db   :  { %1940 = vmatprep.subr.bf16.mxu0 %v2178_v0 }
 0x5a8   :  { %v661_v47 = vpop.f32.mrb[6].mxu0 }
 0x5a9   :  { %v665_v48 = vadd.f32 %v661_v47, %v591_v46  ;;  %v1754_v49 = vpop.f32.mrb[7].mxu0 }
 0x5ab   :  { %2009 = vtanh.f32 %v665_v48 }
 0x5b5   :  { %v2010_v50 = vpop.eup %2009 }
 0x5b6   :  { %668 = vst.msk [vmem:[#allocation2 + $0xa] sm:$0x3] %vm272_vm2, %v2010_v50  ;;  %1764 = vmatmul.mubr.msk.f32.vlgmr.msra.gmra.mrb[6].mxu1 %vm112_vm1, %v2010_v50 }
 0x5b7   :  { %1785 = vmatprep.mubr.msk.f32.mxu1 %vm112_vm1, %v836_v51  ;;  %1935 = vmatpush3.bf16.msra.mxu1 %v1932_v59 }
 0x5b8   :  { %1937 = vmatprep.subr.bf16.mxu1 %v1936_v62 }
 0x5bb   :  { %1939 = vmatpush3.bf16.msra.mxu1 %v1936_v62 }
 0x5bc   :  { %1946 = vmatprep.subr.bf16.mxu1 %v2178_v0 }
 0x689   :  { %v740_v53 = vpop.f32.mrb[6].mxu1 }
 0x68a   :  { %v744_v54 = vadd.f32 %v740_v53, %v670_v52  ;;  %v1765_v55 = vpop.f32.mrb[7].mxu1 }
 0x68c   :  { %2011 = vtanh.f32 %v744_v54 }
 0x696   :  { %v2012_v56 = vpop.eup %2011 }
 0x697   :  { %747 = vst.msk [vmem:[#allocation2 + $0xc] sm:$0x3] %vm272_vm2, %v2012_v56  ;;  %1775 = vmatmul.mubr.msk.f32.vlgmr.msra.gmra.mrb[8].mxu0 %vm112_vm1, %v2012_v56 }
 0x698   :  { %1796 = vmatprep.mubr.msk.f32.mxu0 %vm2179_vm0, %v2180_v1  ;;  %1942 = vmatpush3.bf16.msra.mxu0 %v2390_v4 }
 0x699   :  { %1943 = vmatprep.subr.bf16.mxu0 %v2178_v0 }
 0x69c   :  { %1945 = vmatpush3.bf16.msra.mxu0 %v2393_v6 }
 0x69d   :  { %1952 = vmatprep.subr.bf16.mxu0 %v2178_v0 }
 0x69f   :  { %1797 = vmatmul.mubr.f32.vlgmr.msra.gmra.mrb[10].mxu0 %v2180_v1 }
 0x6a0   :  { %1954 = vmatpush3.bf16.msra.mxu0 %v2390_v4  ;;  %1818 = vmatprep.mubr.msk.f32.mxu0 %vm2179_vm0, %v2180_v1 }
 0x6a1   :  { %1955 = vmatprep.subr.bf16.mxu0 %v2178_v0 }
 0x6a4   :  { %1957 = vmatpush3.bf16.msra.mxu0 %v2393_v6 }
 0x6a5   :  { %1964 = vmatprep.subr.bf16.mxu0 %v2178_v0 }
 0x76a   :  { %v819_v8 = vpop.f32.mrb[8].mxu0 }
 0x76b   :  { %v823_v9 = vadd.f32 %v819_v8, %v749_v7  ;;  %v1776_v10 = vpop.f32.mrb[9].mxu0 }
 0x76d   :  { %2013 = vtanh.f32 %v823_v9 }
 0x772   :  { %v994_v13 = vpop.f32.mrb[10].mxu0 }
 0x773   :  { %v1798_v14 = vpop.f32.mrb[11].mxu0 }
 0x777   :  { %v2014_v11 = vpop.eup %2013 }
 0x778   :  { %826 = vst.msk [vmem:[#allocation2 + $0xe] sm:$0x3] %vm272_vm2, %v2014_v11 }
 0x77f   :  { %v837_v12 = vld [vmem:[#allocation2 + $0x8] sm:$0xff] }
 0x780   :  { %1786 = vmatmul.mubr.msk.f32.vlgmr.msra.gmra.mrb[8].mxu1 %vm112_vm1, %v837_v12 }
 0x781   :  { %1948 = vmatpush3.bf16.msra.mxu1 %v2390_v4  ;;  %1807 = vmatprep.mubr.msk.f32.mxu1 %vm2179_vm0, %v2180_v1 }
 0x782   :  { %1949 = vmatprep.subr.bf16.mxu1 %v2178_v0 }
 0x785   :  { %1951 = vmatpush3.bf16.msra.mxu1 %v2393_v6 }
 0x786   :  { %1958 = vmatprep.subr.bf16.mxu1 %v2178_v0 }
 0x853   :  { %v1787_v16 = vpop.f32.mrb[8].mxu1 }
 0x854   :  { %v922_v17 = vadd.f32 %v1787_v16, %v1576_v15  ;;  %v916_v18 = vpop.f32.mrb[9].mxu1 }
 0x855   :  { %v917_v19 = vadd.f32 %v1576_v15, %v916_v18 }
 0x856   :  { %926 = vst.msk [vmem:[#allocation3 + $0x8] sm:$0xff] %vm112_vm1, %v922_v17 }
 0x857   :  { %925 = vst.msk [vmem:[#allocation3] sm:$0xff] %vm112_vm1, %v917_v19 }
 0x85d   :  { %v1235_v38 = vld [vmem:[#allocation3 + $0x8] sm:$0x3]  ;;  %v1313_v43 = vld [vmem:[#allocation3 + $0xa] sm:$0x3]  ;;  %v1391_v48 = vld [vmem:[#allocation3 + $0xc] sm:$0x3] }
 0x85e   :  { %v927_v20 = vld [vmem:[#allocation3] sm:$0x3]  ;;  %v1001_v23 = vld [vmem:[#allocation3 + $0x2] sm:$0x3]  ;;  %v1079_v28 = vld [vmem:[#allocation3 + $0x4] sm:$0x3] }
 0x85f   :  { %v998_v21 = vadd.f32 %v994_v13, %v927_v20  ;;  %v1157_v33 = vld [vmem:[#allocation3 + $0x6] sm:$0x3] }
 0x861   :  { %2015 = vtanh.f32 %v998_v21 }
 0x86b   :  { %v2016_v22 = vpop.eup %2015 }
 0x86c   :  { %1000 = vst.msk [vmem:[#allocation13] sm:$0x3] %vm272_vm2, %v2016_v22  ;;  %1808 = vmatmul.mubr.msk.f32.vlgmr.msra.gmra.mrb[10].mxu1 %vm112_vm1, %v2016_v22 }
 0x86d   :  { %1960 = vmatpush3.bf16.msra.mxu1 %v2390_v4  ;;  %1829 = vmatprep.mubr.msk.f32.mxu1 %vm2179_vm0, %v2180_v1 }
 0x86e   :  { %1961 = vmatprep.subr.bf16.mxu1 %v2178_v0 }
 0x871   :  { %1963 = vmatpush3.bf16.msra.mxu1 %v2393_v6 }
 0x872   :  { %1970 = vmatprep.subr.bf16.mxu1 %v2178_v0 }
 0x93f   :  { %v1071_v24 = vpop.f32.mrb[10].mxu1 }
 0x940   :  { %v1075_v25 = vadd.f32 %v1071_v24, %v1001_v23  ;;  %v1809_v26 = vpop.f32.mrb[11].mxu1 }
 0x942   :  { %2017 = vtanh.f32 %v1075_v25 }
 0x94c   :  { %v2018_v27 = vpop.eup %2017 }
 0x94d   :  { %1078 = vst.msk [vmem:[#allocation13 + $0x2] sm:$0x3] %vm272_vm2, %v2018_v27  ;;  %1819 = vmatmul.mubr.msk.f32.vlgmr.msra.gmra.mrb[12].mxu0 %vm112_vm1, %v2018_v27 }
 0x94e   :  { %1966 = vmatpush3.bf16.msra.mxu0 %v2390_v4  ;;  %1840 = vmatprep.mubr.msk.f32.mxu0 %vm2179_vm0, %v2180_v1 }
 0x94f   :  { %1967 = vmatprep.subr.bf16.mxu0 %v2178_v0 }
 0x952   :  { %1969 = vmatpush3.bf16.msra.mxu0 %v2393_v6 }
 0x953   :  { %1976 = vmatprep.subr.bf16.mxu0 %v2178_v0 }
 0xa20   :  { %v1149_v29 = vpop.f32.mrb[12].mxu0 }
 0xa21   :  { %v1153_v30 = vadd.f32 %v1149_v29, %v1079_v28  ;;  %v1820_v31 = vpop.f32.mrb[13].mxu0 }
 0xa23   :  { %2019 = vtanh.f32 %v1153_v30 }
 0xa2d   :  { %v2020_v32 = vpop.eup %2019 }
 0xa2e   :  { %1156 = vst.msk [vmem:[#allocation13 + $0x4] sm:$0x3] %vm272_vm2, %v2020_v32  ;;  %1830 = vmatmul.mubr.msk.f32.vlgmr.msra.gmra.mrb[12].mxu1 %vm112_vm1, %v2020_v32 }
 0xa2f   :  { %1972 = vmatpush3.bf16.msra.mxu1 %v2390_v4  ;;  %1851 = vmatprep.mubr.msk.f32.mxu1 %vm2179_vm0, %v2180_v1 }
 0xa30   :  { %1973 = vmatprep.subr.bf16.mxu1 %v2178_v0 }
 0xa33   :  { %1975 = vmatpush3.bf16.msra.mxu1 %v2393_v6 }
 0xa34   :  { %1982 = vmatprep.subr.bf16.mxu1 %v2178_v0 }
 0xb01   :  { %v1227_v34 = vpop.f32.mrb[12].mxu1 }
 0xb02   :  { %v1231_v35 = vadd.f32 %v1227_v34, %v1157_v33  ;;  %v1831_v36 = vpop.f32.mrb[13].mxu1 }
 0xb04   :  { %2021 = vtanh.f32 %v1231_v35 }
 0xb0e   :  { %v2022_v37 = vpop.eup %2021 }
 0xb0f   :  { %1234 = vst.msk [vmem:[#allocation13 + $0x6] sm:$0x3] %vm272_vm2, %v2022_v37  ;;  %1841 = vmatmul.mubr.msk.f32.vlgmr.msra.gmra.mrb[14].mxu0 %vm112_vm1, %v2022_v37 }
 0xb10   :  { %1978 = vmatpush3.bf16.msra.mxu0 %v2390_v4  ;;  %1862 = vmatprep.mubr.msk.f32.mxu0 %vm2179_vm0, %v2180_v1 }
 0xb11   :  { %1979 = vmatprep.subr.bf16.mxu0 %v2178_v0 }
 0xb14   :  { %1981 = vmatpush3.bf16.msra.mxu0 %v2393_v6 }
 0xbe2   :  { %v1305_v39 = vpop.f32.mrb[14].mxu0 }
 0xbe3   :  { %v1309_v40 = vadd.f32 %v1305_v39, %v1235_v38  ;;  %v1842_v41 = vpop.f32.mrb[15].mxu0 }
 0xbe5   :  { %2023 = vtanh.f32 %v1309_v40 }
 0xbef   :  { %v2024_v42 = vpop.eup %2023 }
 0xbf0   :  { %1312 = vst.msk [vmem:[#allocation13 + $0x8] sm:$0x3] %vm272_vm2, %v2024_v42  ;;  %1852 = vmatmul.mubr.msk.f32.vlgmr.msra.gmra.mrb[14].mxu1 %vm112_vm1, %v2024_v42 }
 0xbf1   :  { %1984 = vmatpush3.bf16.msra.mxu1 %v2390_v4  ;;  %1873 = vmatprep.mubr.msk.f32.mxu1 %vm2179_vm0, %v2180_v1 }
 0xbf2   :  { %1985 = vmatprep.subr.bf16.mxu1 %v2178_v0  ;;  %v1469_v0 = vld [vmem:[#allocation3 + $0xe] sm:$0x3] }
 0xbf5   :  { %1987 = vmatpush3.bf16.msra.mxu1 %v2393_v6 }
 0xcc3   :  { %v1383_v44 = vpop.f32.mrb[14].mxu1 }
 0xcc4   :  { %v1387_v45 = vadd.f32 %v1383_v44, %v1313_v43  ;;  %v1853_v46 = vpop.f32.mrb[15].mxu1 }
 0xcc6   :  { %2025 = vtanh.f32 %v1387_v45 }
 0xcd0   :  { %v2026_v47 = vpop.eup %2025 }
 0xcd1   :  { %1390 = vst.msk [vmem:[#allocation13 + $0xa] sm:$0x3] %vm272_vm2, %v2026_v47  ;;  %1863 = vmatmul.mubr.msk.f32.vlgmr.msra.gmra.mrb[16].mxu0 %vm112_vm1, %v2026_v47 }
 0xda4   :  { %v1461_v49 = vpop.f32.mrb[16].mxu0 }
 0xda5   :  { %v1465_v50 = vadd.f32 %v1461_v49, %v1391_v48  ;;  %v1864_v51 = vpop.f32.mrb[17].mxu0 }
 0xda7   :  { %2027 = vtanh.f32 %v1465_v50 }
 0xdb1   :  { %v2028_v1 = vpop.eup %2027 }
 0xdb2   :  { %1468 = vst.msk [vmem:[#allocation13 + $0xc] sm:$0x3] %vm272_vm2, %v2028_v1  ;;  %1874 = vmatmul.mubr.msk.f32.vlgmr.msra.gmra.mrb[16].mxu1 %vm112_vm1, %v2028_v1 }
 0xe85   :  { %v1539_v52 = vpop.f32.mrb[16].mxu1 }
 0xe86   :  { %v1543_v53 = vadd.f32 %v1539_v52, %v1469_v0  ;;  %v1875_v54 = vpop.f32.mrb[17].mxu1 }
 0xe88   :  { %2029 = vtanh.f32 %v1543_v53 }
 0xe92   :  { %v2030_v55 = vpop.eup %2029 }
 0xe93   :  { %1546 = vst.msk [vmem:[#allocation13 + $0xe] sm:$0x3] %vm272_vm2, %v2030_v55 }
 0xe94   :  { %2152 = shalt.err (!%p2149_p2)
}
 0xe95   :  { %s2153_s21 = scalar_lea.hbm %s2483_s7, 256 }
 0xe96   :  { %p2154_p3 = scmp.ne.s32.totalorder %s2483_s7, %s2153_s21  ;;  %p2157_p4 = scmp.lt.u32.totalorder %s2153_s21, %s2483_s7 }
 0xe98   :  { %p2159_p5 = pnand %p2157_p4, %p2154_p3 }
 0xe9a   :  { %2162 = shalt.err (!%p2159_p5)
}
 0xe9b   :  { %1558 = dma.vmem_to_hbm [thread:$0]  %s1553_s17, 256, %s2483_s7, [#allocation6], %s2173_s13, %s2173_s13, %s2174_s14  }
 0xe9c   :  { %2169 = dma.done.wait [#allocation6], 256  }
 0xe9d   :  { %2170 = vsyncadd [#allocation6], 4294967040 }
 0xe9e   :  { %1562 = vsyncpa [#allocation5], 1 }
 0xe9f   :  { %1563 = vsyncpa [#allocation8], 1 }
 0xea0   :  { %1564 = vsyncpa [#allocation11], 1 }
 0xea1   :  { %1565 = vsyncpa [#allocation6], 1 }

</bundles_post_ra>
